<compile_context>
chip_gen: v5e
topology: v5e:2x2
jax: 0.10.0
libtpu: 0.0.40
codegen_flags: <defaults>
</compile_context>

<pallas_src>
import jax
import jax.numpy as jnp
from jax.experimental import pallas as pl
from jax.experimental.pallas import tpu as pltpu


# ---- model hyperparameters (small, consistent with the module) ----
INPUTDIM = 16
LAYERS = [32, 32]
K = 4
TEMP = 1000.0
BATCH = 8

_SELU_ALPHA = 1.6732632423543772
_SELU_SCALE = 1.0507009873554805

# f32 x+out tiles double-buffered at this width ~= 7.3 MiB: > 85% of HBM
# roofline per the 0.35us/step overhead model, and safely inside v7x's
# 32 MiB scoped-VMEM default (128 MiB physical on v5e/v6e, 64 MiB on v7x).
_MAX_TB = 32768


def _selu(x):
    # Clamp the exp argument so the (discarded) positive branch never overflows.
    return _SELU_SCALE * jnp.where(
        x > 0, x, _SELU_ALPHA * (jnp.exp(jnp.minimum(x, 0.0)) - 1.0))


def _relu6(x):
    return jnp.clip(x, 0.0, 6.0)


def _round_up(n, m):
    return ((n + m - 1) // m) * m


def dsm_kernel(x_ref, w1_ref, w2_ref, wh_ref, bh_ref, off_ref, out_ref):
    """One batch tile.  Layout: batch on the lane axis.

    x_ref   : (INPUTDIM, TB)  input tile (pipelined)
    w1_ref  : (L0, INPUTDIM)  embedding layer 1, torch (out, in) layout
    w2_ref  : (L1, L0)        embedding layer 2
    wh_ref  : (3K, L1)        fused heads: rows [0,K) shape, [K,2K) scale,
                              [2K,3K) gate (1/temp pre-folded into gate rows)
    bh_ref  : (2K, 1)  f32    shape|scale head bias
    off_ref : (2K, 1)  f32    shape|scale distribution-parameter offsets
    out_ref : (3K, TB) f32    fused output tile (lane-dense stores)
    """
    cdt = w2_ref.dtype  # MXU operand dtype (f32 or bf16); VPU math stays f32

    # Embedding MLP: Linear(bias=False) + ReLU6, twice (N = TB, full MXU width).
    h = _relu6(jnp.dot(w1_ref[...], x_ref[...],
                       preferred_element_type=jnp.float32)).astype(cdt)
    h = _relu6(jnp.dot(w2_ref[...], h,
                       preferred_element_type=jnp.float32)).astype(cdt)

    # Fused heads: one matmul, then a static row split at the sublane-aligned
    # 2K = 8 boundary: SELU+bias+offset rows vs pass-through gate rows.
    z = jnp.dot(wh_ref[...], h, preferred_element_type=jnp.float32)
    out_ref[0:2 * K, :] = _selu(z[0:2 * K, :] + bh_ref[...]) + off_ref[...]
    out_ref[2 * K:, :] = z[2 * K:, :]          # gate; 1/temp folded into weights


def prepare_params(params, compute_dtype=jnp.float32):
    """One-time parameter prep (layout plumbing, outside the kernel)."""
    w1, w2, wsh, bsh, wsc, bsc, wg, shape_p, scale_p = params
    w1_t = w1.T.astype(compute_dtype)                                 # (L0, INPUTDIM)
    w2_t = w2.T.astype(compute_dtype)                                 # (L1, L0)
    wg_scaled = (wg * jnp.float32(1.0 / TEMP)).astype(jnp.float32)    # fold gate temp
    wh = jnp.concatenate([wsh, wsc, wg_scaled],
                         axis=1).T.astype(compute_dtype)              # (3K, L1)
    bh = jnp.concatenate([bsh, bsc], axis=1).T.astype(jnp.float32)    # (2K, 1)
    off = jnp.concatenate([shape_p, scale_p],
                          axis=1).T.astype(jnp.float32)               # (2K, 1)
    return (w1_t, w2_t, wh, bh, off)


def _pick_tiling(batch, block_batch=None):
    """Return (tb, b_pad): lane tile size and padded batch (both multiples of 128)."""
    b128 = _round_up(max(batch, 1), 128)
    if block_batch is not None:
        tb = max(128, _round_up(block_batch, 128))
        return tb, _round_up(b128, tb)
    if b128 <= 128:
        return 128, 128
    # At least two tiles (so v7x megacore splits the batch across both TCs),
    # each as wide as possible up to _MAX_TB; rebalance to minimize padding.
    tb = min(_MAX_TB, _round_up((b128 + 1) // 2, 128))
    n = -(-b128 // tb)
    tb = _round_up(-(-b128 // n), 128)
    return tb, n * tb


def dsm_forward_lanes(x_t, prepped, *, block_batch=None, x_buffer_count=2):
    """Hot path: x_t is (INPUTDIM, B) with batch on lanes; returns the fused
    (3K, B_pad) slab (rows [0,K) shape, [K,2K) scale, [2K,3K) gate).  No
    transpose or output slice passes; padding only when B % tile != 0."""
    w1_t, w2_t, wh, bh, off = prepped
    inputdim, batch = x_t.shape
    assert inputdim == INPUTDIM
    if x_t.dtype != wh.dtype:
        x_t = x_t.astype(wh.dtype)

    tb, b_pad = _pick_tiling(batch, block_batch)
    if b_pad != batch:
        x_t = jnp.pad(x_t, ((0, 0), (0, b_pad - batch)))

    threek = 3 * K
    grid = (b_pad // tb,)
    dsize = jnp.dtype(wh.dtype).itemsize
    weight_bytes = sum(int(a.size) * a.dtype.itemsize
                       for a in (w1_t, w2_t, wh, bh, off))

    # Streamed-input spec; buffering depth sweepable (only x needs it — the
    # weight/bias/offset specs have constant index_maps and stay VMEM-resident).
    if x_buffer_count > 2:
        x_spec = pl.BlockSpec((INPUTDIM, tb), lambda i: (0, i),
                              pipeline_mode=pl.Buffered(x_buffer_count))
    else:
        x_spec = pl.BlockSpec((INPUTDIM, tb), lambda i: (0, i))

    # Raise scoped VMEM only if a user-chosen tile needs it (default fits).
    vmem_need = (x_buffer_count * INPUTDIM * tb * dsize
                 + 2 * threek * tb * 4 + weight_bytes + (1 << 20))
    vmem_limit = int(min(vmem_need, 64 << 20)) if vmem_need > (30 << 20) else None

    cost = pl.CostEstimate(
        flops=2 * (INPUTDIM * LAYERS[0] + LAYERS[0] * LAYERS[1]
                   + LAYERS[1] * threek) * b_pad,
        transcendentals=2 * K * b_pad,                      # SELU exp rows
        bytes_accessed=(INPUTDIM * dsize + threek * 4) * b_pad + weight_bytes)

    out = pl.pallas_call(
        dsm_kernel,
        out_shape=jax.ShapeDtypeStruct((threek, b_pad), jnp.float32),
        grid=grid,
        in_specs=[
            x_spec,                                         # x tile (pipelined)
            pl.BlockSpec(w1_t.shape, lambda i: (0, 0)),     # weights: VMEM-resident
            pl.BlockSpec(w2_t.shape, lambda i: (0, 0)),
            pl.BlockSpec(wh.shape, lambda i: (0, 0)),
            pl.BlockSpec(bh.shape, lambda i: (0, 0)),
            pl.BlockSpec(off.shape, lambda i: (0, 0)),
        ],
        out_specs=pl.BlockSpec((threek, tb), lambda i: (0, i)),
        compiler_params=pltpu.CompilerParams(
            dimension_semantics=("parallel",),              # megacore split on v7x
            vmem_limit_bytes=vmem_limit),
        cost_estimate=cost,
    )(x_t, w1_t, w2_t, wh, bh, off)
    return out


def dsm_forward(x, params, *, compute_dtype=jnp.float32, block_batch=None,
                x_buffer_count=2):
    """Torch-style convenience wrapper: x is (B, INPUTDIM), returns
    (shape, scale, gate) each (B, K).  For large batches prefer producing x in
    (INPUTDIM, B) layout and consuming the fused (3K, B) slab via
    dsm_forward_lanes -- the transpose in/out here is two extra HBM passes."""
    batch = x.shape[0]
    prepped = prepare_params(params, compute_dtype)
    out = dsm_forward_lanes(x.T.astype(compute_dtype), prepped,
                            block_batch=block_batch,
                            x_buffer_count=x_buffer_count)
    out = out[:, :batch].T                                  # layout plumbing (demo)
    return out[:, :K], out[:, K:2 * K], out[:, 2 * K:]


def init_params(key):
    """Deterministic synthetic init (dist='Weibull' => shape/scale = -ones(k))."""
    keys = jax.random.split(key, 6)
    # Embedding weights stored transposed vs torch: (in, out)
    w1 = jax.random.normal(keys[0], (INPUTDIM, LAYERS[0]), jnp.float32) * 0.1
    w2 = jax.random.normal(keys[1], (LAYERS[0], LAYERS[1]), jnp.float32) * 0.1
    wsh = jax.random.normal(keys[2], (LAYERS[-1], K), jnp.float32) * 0.1
    bsh = jax.random.normal(keys[3], (1, K), jnp.float32) * 0.1
    wsc = jax.random.normal(keys[4], (LAYERS[-1], K), jnp.float32) * 0.1
    bsc = jax.random.normal(keys[5], (1, K), jnp.float32) * 0.1
    wg = jax.random.normal(jax.random.fold_in(key, 99), (LAYERS[-1], K), jnp.float32) * 0.1
    shape_p = -jnp.ones((1, K), jnp.float32)     # Weibull init
    scale_p = -jnp.ones((1, K), jnp.float32)
    return (w1, w2, wsh, bsh, wsc, bsc, wg, shape_p, scale_p)


def dsm_reference(x, params):
    """Pure-JAX reference (full f32 matmuls) for the correctness check."""
    w1, w2, wsh, bsh, wsc, bsc, wg, shape_p, scale_p = params
    hp = jax.lax.Precision.HIGHEST
    h = _relu6(jnp.dot(x, w1, precision=hp))
    h = _relu6(jnp.dot(h, w2, precision=hp))
    out_sh = _selu(jnp.dot(h, wsh, precision=hp) + bsh) + shape_p
    out_sc = _selu(jnp.dot(h, wsc, precision=hp) + bsc) + scale_p
    out_g = jnp.dot(h, wg, precision=hp) / TEMP
    return out_sh, out_sc, out_g


if __name__ == "__main__":
    key = jax.random.PRNGKey(0)
    kx, kp = jax.random.split(key)
    x = jax.random.normal(kx, (BATCH, INPUTDIM), jnp.float32)
    params = init_params(kp)

    out_shape, out_scale, out_gate = dsm_forward(x, params)
    jax.block_until_ready((out_shape, out_scale, out_gate))

    ref_shape, ref_scale, ref_gate = dsm_reference(x, params)
    assert out_shape.shape == (BATCH, K)
    assert jnp.allclose(out_shape, ref_shape, atol=1e-5), "shape head mismatch"
    assert jnp.allclose(out_scale, ref_scale, atol=1e-5), "scale head mismatch"
    assert jnp.allclose(out_gate, ref_gate, atol=1e-6), "gate head mismatch"

    print("KERNEL_OK")
</pallas_src>

<mosaic_0001>
module attributes {stable_mosaic.version = 11 : i64} {
  func.func @dsm_kernel(%arg0: i32, %arg1: memref<16x128xf32, #tpu.memory_space<vmem>>, %arg2: memref<32x16xf32, #tpu.memory_space<vmem>>, %arg3: memref<32x32xf32, #tpu.memory_space<vmem>>, %arg4: memref<12x32xf32, #tpu.memory_space<vmem>>, %arg5: memref<8x1xf32, #tpu.memory_space<vmem>>, %arg6: memref<8x1xf32, #tpu.memory_space<vmem>>, %arg7: memref<12x128xf32, #tpu.memory_space<vmem>>) attributes {dimension_semantics = [#tpu.dimension_semantics<parallel>], iteration_bounds = array<i64: 1>, scalar_prefetch = 0 : i64, scratch_operands = 0 : i64, tpu.core_type = #tpu.core_type<tc>, window_params = [{transform_indices = @transform_0, window_bounds = array<i64: 16, 128>}, {pipeline_mode = #tpu.pipeline_mode<synchronous>, transform_indices = @transform_1, window_bounds = array<i64: 32, 16>}, {pipeline_mode = #tpu.pipeline_mode<synchronous>, transform_indices = @transform_2, window_bounds = array<i64: 32, 32>}, {pipeline_mode = #tpu.pipeline_mode<synchronous>, transform_indices = @transform_3, window_bounds = array<i64: 12, 32>}, {pipeline_mode = #tpu.pipeline_mode<synchronous>, transform_indices = @transform_4, window_bounds = array<i64: 8, 1>}, {pipeline_mode = #tpu.pipeline_mode<synchronous>, transform_indices = @transform_5, window_bounds = array<i64: 8, 1>}, {transform_indices = @transform_6, window_bounds = array<i64: 12, 128>}]} {
    %c0 = arith.constant 0 : index
    %c0_0 = arith.constant 0 : index
    %0 = vector.load %arg2[%c0, %c0_0] : memref<32x16xf32, #tpu.memory_space<vmem>>, vector<32x16xf32>
    %c0_1 = arith.constant 0 : index
    %c0_2 = arith.constant 0 : index
    %1 = vector.load %arg1[%c0_1, %c0_2] : memref<16x128xf32, #tpu.memory_space<vmem>>, vector<16x128xf32>
    %cst = arith.constant dense<0.000000e+00> : vector<32x128xf32>
    %2 = tpu.matmul %0, %1, %cst {dimension_numbers = #tpu.dot_dimension_numbers<[1], [0], [0], [1], [0, 0, 1, 1], [], []>} : vector<32x16xf32>, vector<16x128xf32>, vector<32x128xf32> -> vector<32x128xf32>
    %cst_3 = arith.constant 0.000000e+00 : f32
    %cst_4 = arith.constant 6.000000e+00 : f32
    %3 = vector.broadcast %cst_3 : f32 to vector<32x128xf32>
    %4 = arith.maximumf %3, %2 : vector<32x128xf32>
    %5 = vector.broadcast %cst_4 : f32 to vector<32x128xf32>
    %6 = arith.minimumf %5, %4 : vector<32x128xf32>
    %c0_5 = arith.constant 0 : index
    %c0_6 = arith.constant 0 : index
    %7 = vector.load %arg3[%c0_5, %c0_6] : memref<32x32xf32, #tpu.memory_space<vmem>>, vector<32x32xf32>
    %cst_7 = arith.constant dense<0.000000e+00> : vector<32x128xf32>
    %8 = tpu.matmul %7, %6, %cst_7 {dimension_numbers = #tpu.dot_dimension_numbers<[1], [0], [0], [1], [0, 0, 1, 1], [], []>} : vector<32x32xf32>, vector<32x128xf32>, vector<32x128xf32> -> vector<32x128xf32>
    %cst_8 = arith.constant 0.000000e+00 : f32
    %cst_9 = arith.constant 6.000000e+00 : f32
    %9 = vector.broadcast %cst_8 : f32 to vector<32x128xf32>
    %10 = arith.maximumf %9, %8 : vector<32x128xf32>
    %11 = vector.broadcast %cst_9 : f32 to vector<32x128xf32>
    %12 = arith.minimumf %11, %10 : vector<32x128xf32>
    %c0_10 = arith.constant 0 : index
    %c0_11 = arith.constant 0 : index
    %13 = vector.load %arg4[%c0_10, %c0_11] : memref<12x32xf32, #tpu.memory_space<vmem>>, vector<12x32xf32>
    %cst_12 = arith.constant dense<0.000000e+00> : vector<12x128xf32>
    %14 = tpu.matmul %13, %12, %cst_12 {dimension_numbers = #tpu.dot_dimension_numbers<[1], [0], [0], [1], [0, 0, 1, 1], [], []>} : vector<12x32xf32>, vector<32x128xf32>, vector<12x128xf32> -> vector<12x128xf32>
    %15 = vector.extract_strided_slice %14 {offsets = [0, 0], sizes = [8, 128], strides = [1, 1]} : vector<12x128xf32> to vector<8x128xf32>
    %c0_13 = arith.constant 0 : index
    %c0_14 = arith.constant 0 : index
    %16 = vector.load %arg5[%c0_13, %c0_14] : memref<8x1xf32, #tpu.memory_space<vmem>>, vector<8x1xf32>
    %17 = vector.broadcast %16 : vector<8x1xf32> to vector<8x128xf32>
    %18 = arith.addf %15, %17 : vector<8x128xf32>
    %cst_15 = arith.constant 0.000000e+00 : f32
    %19 = vector.broadcast %cst_15 : f32 to vector<8x128xf32>
    %20 = arith.cmpf ogt, %18, %19 : vector<8x128xf32>
    %cst_16 = arith.constant 0.000000e+00 : f32
    %21 = vector.broadcast %cst_16 : f32 to vector<8x128xf32>
    %22 = arith.minimumf %18, %21 : vector<8x128xf32>
    %23 = math.exp %22 : vector<8x128xf32>
    %cst_17 = arith.constant 1.000000e+00 : f32
    %24 = vector.broadcast %cst_17 : f32 to vector<8x128xf32>
    %25 = arith.subf %23, %24 : vector<8x128xf32>
    %cst_18 = arith.constant 1.67326319 : f32
    %26 = vector.broadcast %cst_18 : f32 to vector<8x128xf32>
    %27 = arith.mulf %26, %25 : vector<8x128xf32>
    %28 = arith.select %20, %18, %27 : vector<8x128xi1>, vector<8x128xf32>
    %cst_19 = arith.constant 1.05070102 : f32
    %29 = vector.broadcast %cst_19 : f32 to vector<8x128xf32>
    %30 = arith.mulf %29, %28 : vector<8x128xf32>
    %c0_20 = arith.constant 0 : index
    %c0_21 = arith.constant 0 : index
    %31 = vector.load %arg6[%c0_20, %c0_21] : memref<8x1xf32, #tpu.memory_space<vmem>>, vector<8x1xf32>
    %32 = vector.broadcast %31 : vector<8x1xf32> to vector<8x128xf32>
    %33 = arith.addf %30, %32 : vector<8x128xf32>
    %c0_22 = arith.constant 0 : index
    %c0_23 = arith.constant 0 : index
    %34 = vector.load %arg7[%c0_22, %c0_23] : memref<12x128xf32, #tpu.memory_space<vmem>>, vector<8x128xf32>
    tpu.vector_store %arg7[%c0_22, %c0_23], %33 {strides = array<i32>} : memref<12x128xf32, #tpu.memory_space<vmem>>, vector<8x128xf32>,
    %35 = vector.extract_strided_slice %14 {offsets = [8, 0], sizes = [4, 128], strides = [1, 1]} : vector<12x128xf32> to vector<4x128xf32>
    %c8 = arith.constant 8 : index
    %c0_24 = arith.constant 0 : index
    %36 = vector.load %arg7[%c8, %c0_24] : memref<12x128xf32, #tpu.memory_space<vmem>>, vector<4x128xf32>
    tpu.vector_store %arg7[%c8, %c0_24], %35 {strides = array<i32>} : memref<12x128xf32, #tpu.memory_space<vmem>>, vector<4x128xf32>,
    return
  }
  func.func @transform_0(%arg0: i32) -> (i32, i32) {
    %c0_i32 = arith.constant 0 : i32
    %c0_i32_0 = arith.constant 0 : i32
    return %c0_i32, %arg0 : i32, i32
  }
  func.func @transform_1(%arg0: i32) -> (i32, i32) {
    %c0_i32 = arith.constant 0 : i32
    %c0_i32_0 = arith.constant 0 : i32
    %c0_i32_1 = arith.constant 0 : i32
    return %c0_i32, %c0_i32_0 : i32, i32
  }
  func.func @transform_2(%arg0: i32) -> (i32, i32) {
    %c0_i32 = arith.constant 0 : i32
    %c0_i32_0 = arith.constant 0 : i32
    %c0_i32_1 = arith.constant 0 : i32
    return %c0_i32, %c0_i32_0 : i32, i32
  }
  func.func @transform_3(%arg0: i32) -> (i32, i32) {
    %c0_i32 = arith.constant 0 : i32
    %c0_i32_0 = arith.constant 0 : i32
    %c0_i32_1 = arith.constant 0 : i32
    return %c0_i32, %c0_i32_0 : i32, i32
  }
  func.func @transform_4(%arg0: i32) -> (i32, i32) {
    %c0_i32 = arith.constant 0 : i32
    %c0_i32_0 = arith.constant 0 : i32
    %c0_i32_1 = arith.constant 0 : i32
    return %c0_i32, %c0_i32_0 : i32, i32
  }
  func.func @transform_5(%arg0: i32) -> (i32, i32) {
    %c0_i32 = arith.constant 0 : i32
    %c0_i32_0 = arith.constant 0 : i32
    %c0_i32_1 = arith.constant 0 : i32
    return %c0_i32, %c0_i32_0 : i32, i32
  }
  func.func @transform_6(%arg0: i32) -> (i32, i32) {
    %c0_i32 = arith.constant 0 : i32
    %c0_i32_0 = arith.constant 0 : i32
    return %c0_i32, %arg0 : i32, i32
  }
}

</mosaic_0001>

<bundles_post_ra>
// kernel: tpu_custom_call.1
= control target key start
LH: loop header
LB: loop body
LE: loop exit
PB: predicated region body
PF: predicated region fallthrough
CT: control target
= control target key end

     0   :  { %11 = vsyncpa [#allocation3], 0  ;;  %s395_s0 = inlined_call_operand.vmem [shape: f32[16,128], index: 0, kind: input, shape index: {}]   ;;  %s396_s1 = inlined_call_operand.vmem [shape: f32[32,16], index: 1, kind: input, shape index: {}]   ;;  %s397_s2 = inlined_call_operand.vmem [shape: f32[32,32], index: 2, kind: input, shape index: {}]   ;;  %s398_s3 = inlined_call_operand.hbm [shape: f32[12,32], index: 3, kind: input, shape index: {}]   ;;  %s399_s4 = inlined_call_operand.vmem [shape: f32[8,1], index: 4, kind: input, shape index: {}]   ;;  %s400_s5 = inlined_call_operand.vmem [shape: f32[8,1], index: 5, kind: input, shape index: {}]   ;;  %s401_s6 = inlined_call_operand.hbm [shape: f32[12,128], index: 6, kind: output, shape index: {}]  }
   0x1   :  { %12 = vsyncpa [#allocation4], 0  ;;  %s23_s23 = sshll.u32 %s398_s3, 4  ;;  %s301_s24 = smov [#allocation2]   ;;  %s24_s23 = int_to_ptr.hbm [resolvable:$true] %s23_s23 }
   0x2   :  { %s25_s25 = sshll.u32 %s301_s24, 4  ;;  %s302_s26 = smov 128   ;;  %s26_s25 = int_to_ptr.vmem [resolvable:$true] %s25_s25 }
   0x3   :  { %s303_s27 = smov 8  }
   0x4   :  { %31 = dma.hbm_to_vmem [thread:$0]  %s24_s23, 256, %s26_s25, [#allocation3], %s302_s26, %s302_s26, %s303_s27  }
   0x5   :  { %297 = dma.done.wait [#allocation3], 256  }
   0x6   :  { %298 = vsyncadd [#allocation3], 4294967040  ;;  %v45_v0 = vld [vmem:[%s395_s0 + $0x8] sm:$0xff]  ;;  %v44_v1 = vld [vmem:[%s395_s0] sm:$0xff]  ;;  %vm46_vm0 = vcmask 130048   ;;  %vm100_vm1 = vcmask 261120  }
   0x7   :  { %73 = vmatpush.msra.mxu0 %v45_v0  ;;  %v40_v2 = vld [vmem:[%s396_s1] sm:$0xff]  ;;  %235 = vmatpush.msra.mxu1 %v45_v0  ;;  %v43_v3 = vld [vmem:[%s396_s1 + $0x18] sm:$0xff]  ;;  %v41_v4 = vld [vmem:[%s396_s1 + $0x8] sm:$0xff]  ;;  %v304_v23 = vmov 0   ;;  %s211_s28 = sshll.u32 %s401_s6, 4  ;;  %s212_s28 = int_to_ptr.hbm [resolvable:$true] %s211_s28 }
   0x8   :  { %v42_v5 = vld [vmem:[%s396_s1 + $0x10] sm:$0xff]  ;;  %v97_v18 = vld [vmem:[%s397_s2 + $0x8] sm:$0xff]  ;;  %v96_v19 = vld [vmem:[%s397_s2] sm:$0xff]  ;;  %246 = vset.pattern.permute.xlu0 %v304_v23 }
   0x9   :  { %74 = vmatpush.msra.mxu0 %v44_v1  ;;  %236 = vmatpush.msra.mxu1 %v44_v1  ;;  %v98_v20 = vld [vmem:[%s397_s2 + $0x10] sm:$0xff]  ;;  %v99_v21 = vld [vmem:[%s397_s2 + $0x18] sm:$0xff]  ;;  %v181_v22 = vld [vmem:[%s399_s4] sm:$0xff]  ;;  %s305_s2 = smov [#allocation5]  }
   0xa   :  { %224 = vmatmul.msk.f32.vlgmr.msra.gmra.mxu0 %vm46_vm0, %v40_v2  ;;  %227 = vmatmul.msk.f32.vlgmr.msra.gmra.mxu1 %vm46_vm0, %v43_v3  ;;  %v196_v25 = vld [vmem:[%s400_s5] sm:$0xff]  ;;  %v151_v38 = vld [vmem:[#allocation2 + $0x8] sm:$0xf]  ;;  %s209_s4 = sshll.u32 %s305_s2, 4  ;;  %s210_s4 = int_to_ptr.vmem [resolvable:$true] %s209_s4 }
   0xb   :  { %184 = vperm.xlu0 %246, %v181_v22   ;;  %v150_v37 = vld [vmem:[#allocation2] sm:$0xff] }
  0x12   :  { %225 = vmatmul.msk.f32.gmra.mxu0 %vm46_vm0, %v41_v4 }
  0x13   :  { %199 = vperm.xlu0 %246, %v196_v25  }
  0x1a   :  { %226 = vmatmul.msk.f32.gmra.mxu0 %vm46_vm0, %v42_v5 }
  0x7d   :  { %v185_v39 = vpop.permute.xlu0 %184 }
  0x85   :  { %v200_v50 = vpop.permute.xlu0 %199 }
  0x87   :  { %v76_v6 = vpop.f32.mrf.mxu0  ;;  %v85_v7 = vpop.f32.mrf.mxu1 }
  0x88   :  { %v91_v8 = vmax.f32 %v85_v7, 0.0  ;;  %v88_v14 = vmax.f32 %v76_v6, 0.0 }
  0x8a   :  { %v95_v9 = vmin.f32 %v91_v8, 6.0  ;;  %v92_v17 = vmin.f32 %v88_v14, 6.0 }
  0x8c   :  { %125 = vmatpush.msrb.mxu1 %v95_v9  ;;  %237 = vmatpush.msra.mxu3 %v95_v9 }
  0x8f   :  { %v79_v10 = vpop.f32.mrf.mxu0 }
  0x90   :  { %v89_v12 = vmax.f32 %v79_v10, 0.0 }
  0x92   :  { %v93_v16 = vmin.f32 %v89_v12, 6.0 }
  0x97   :  { %v82_v11 = vpop.f32.mrf.mxu0 }
  0x98   :  { %v90_v13 = vmax.f32 %v82_v11, 0.0 }
  0x9a   :  { %v94_v15 = vmin.f32 %v90_v13, 6.0 }
  0x9c   :  { %126 = vmatpush.msrb.mxu1 %v94_v15  ;;  %238 = vmatpush.msra.mxu3 %v94_v15 }
  0x9e   :  { %127 = vmatpush.msrb.mxu1 %v93_v16  ;;  %239 = vmatpush.msra.mxu3 %v93_v16 }
  0xa0   :  { %128 = vmatpush.msrb.mxu1 %v92_v17  ;;  %240 = vmatpush.msra.mxu3 %v92_v17 }
  0xa1   :  { %229 = vmatmul.msk.f32.vlgmr.msra.gmra.mxu3 %vm100_vm1, %v97_v18  ;;  %228 = vmatmul.msk.f32.vlgmr.msrb.gmra.mxu1 %vm100_vm1, %v96_v19 }
  0xa9   :  { %230 = vmatmul.msk.f32.gmra.mxu3 %vm100_vm1, %v98_v20 }
  0xb1   :  { %231 = vmatmul.msk.f32.gmra.mxu3 %vm100_vm1, %v99_v21 }
 0x11e   :  { %v130_v28 = vpop.f32.mrf.mxu1 }
 0x11f   :  { %v142_v33 = vmax.f32 %v130_v28, 0.0 }
 0x121   :  { %v146_v36 = vmin.f32 %v142_v33, 6.0 }
 0x124   :  { %v133_v24 = vpop.f32.mrf.mxu3 }
 0x125   :  { %v143_v31 = vmax.f32 %v133_v24, 0.0 }
 0x127   :  { %v147_v35 = vmin.f32 %v143_v31, 6.0 }
 0x12c   :  { %v136_v26 = vpop.f32.mrf.mxu3 }
 0x12d   :  { %v144_v29 = vmax.f32 %v136_v26, 0.0 }
 0x12f   :  { %v148_v34 = vmin.f32 %v144_v29, 6.0 }
 0x134   :  { %v139_v27 = vpop.f32.mrf.mxu3 }
 0x135   :  { %v145_v30 = vmax.f32 %v139_v27, 0.0 }
 0x137   :  { %v149_v32 = vmin.f32 %v145_v30, 6.0 }
 0x139   :  { %170 = vmatpush.msra.mxu2 %v149_v32 }
 0x13b   :  { %171 = vmatpush.msra.mxu2 %v148_v34 }
 0x13d   :  { %172 = vmatpush.msra.mxu2 %v147_v35 }
 0x13f   :  { %173 = vmatpush.msra.mxu2 %v146_v36 }
 0x140   :  { %232 = vmatmul.msk.f32.vlgmr.msra.gmra.mxu2 %vm100_vm1, %v150_v37 }
 0x148   :  { %233 = vmatmul.msk.f32.gmra.mxu2 %vm100_vm1, %v151_v38 }
 0x1c3   :  { %v175_v40 = vpop.f32.mrf.mxu2 }
 0x1c4   :  { %v187_v41 = vadd.f32 %v185_v39, %v175_v40 }
 0x1c6   :  { %v189_v42 = vmin.f32 %v187_v41, 0.0  ;;  %vm188_vm2 = vcmp.gt.f32.partialorder %v187_v41, 0.0 }
 0x1c8   :  { %v190_v43 = vmul.f32 1.442695, %v189_v42 }
 0x1ca   :  { %247 = vpow2.f32 %v190_v43 }
 0x1cb   :  { %v178_v44 = vpop.f32.mrf.mxu2 }
 0x1cc   :  { %204 = vst [vmem:[#allocation5 + $0x8] sm:$0xf] %v178_v44 }
 0x1d0   :  { %v248_v45 = vpop.eup %247 }
 0x1d1   :  { %v234_v46 = vadd.f32 -1.0, %v248_v45 }
 0x1d3   :  { %v193_v47 = vmul.f32 1.6732632, %v234_v46 }
 0x1d5   :  { %v194_v48 = vsel %vm188_vm2, %v187_v41, %v193_v47 }
 0x1d6   :  { %v195_v49 = vmul.f32 1.050701, %v194_v48 }
 0x1d8   :  { %v202_v51 = vadd.f32 %v200_v50, %v195_v49 }
 0x1da   :  { %203 = vst [vmem:[#allocation5] sm:$0xff] %v202_v51 }
 0x1db   :  { %217 = dma.vmem_to_hbm [thread:$0]  %s210_s4, 256, %s212_s28, [#allocation4], %s302_s26, %s302_s26, %s303_s27  }
 0x1dc   :  { %299 = dma.done.wait [#allocation4], 256  }
 0x1dd   :  { %300 = vsyncadd [#allocation4], 4294967040 }
 0x1de   :  { %222 = vsyncpa [#allocation3], 1 }
 0x1df   :  { %223 = vsyncpa [#allocation4], 1 }

</bundles_post_ra>
